<compile_context>
chip_gen: v6e
topology: v6e:2x2x1
jax: 0.10.0
libtpu: 0.0.40
codegen_flags: <defaults>
</compile_context>

<pallas_src>
import functools

import jax
import jax.numpy as jnp
from jax.experimental import pallas as pl
from jax.experimental.pallas import tpu as pltpu


# --------------------------------------------------------------------------
# Kernel
# --------------------------------------------------------------------------
def _basic_block_kernel(x_ref, wb1_ref, b1_ref, wb2_ref, b2_ref, o_ref, *, Hp):
    """One batch-block per grid step.

    Packed layout: row r = n*Hp + p holds image rows 2p and 2p+1 of image n;
    lane = i*(W*C) + x*C + c, with i in {0,1} selecting the image row.

    x_ref  : (rows, 2*W*Cin)                f32
    wb*_ref: (3, 2*W*Cin_l, 2*W*Cout_l)     bf16 banded weights (BN scale folded),
             leading axis = packed-row shift d+1 for d in {-1, 0, +1}
    b*_ref : (1, 2*W*Cout_l)                f32 folded BN bias, tiled over (i, x)
    """
    x = jnp.maximum(x_ref[...], 0.0)            # x = relu(x); also the residual
    rows = x.shape[0]
    # Image-local packed-row index (batch is folded into the row axis).
    p = jax.lax.broadcasted_iota(jnp.int32, (rows, 1), 0) % Hp

    def shifted(a, d):
        # a[r + d] at row r; rows whose source packed-row falls outside the
        # image are zeroed: this is the conv zero padding and it also kills
        # cross-image leakage from the wrapping roll.  Roll = XLU slot; the
        # mask/select stays f32 (v5e has no bf16 VPU).
        rolled = pltpu.roll(a, shift=(-d) % rows, axis=0)
        valid = jnp.logical_and(p + d >= 0, p + d < Hp)
        return jnp.where(valid, rolled, 0.0)

    def conv3x3_bn(a, wb_ref, b_ref):
        # 3 accumulated MXU matmuls, one per packed-row shift; bf16 operands,
        # f32 accumulation.  dx taps / W-padding / BN scale live in the weight.
        acc = jnp.dot(a.astype(jnp.bfloat16), wb_ref[1],
                      preferred_element_type=jnp.float32)
        for d, band in ((-1, 0), (1, 2)):
            acc = acc + jnp.dot(shifted(a, d).astype(jnp.bfloat16),
                                wb_ref[band],
                                preferred_element_type=jnp.float32)
        return acc + b_ref[...]

    h = jnp.maximum(conv3x3_bn(x, wb1_ref, b1_ref), 0.0)       # conv1+bn1+relu
    # TODO(synk): at large row tiles, re-read x_ref here instead of keeping the
    # relu'd residual live across both matmuls (vreg pressure / spills).
    out = conv3x3_bn(h, wb2_ref, b2_ref) + x                   # conv2+bn2+residual
    o_ref[...] = out.astype(o_ref.dtype)


# --------------------------------------------------------------------------
# Wrapper-side weight / BN preprocessing (pure layout plumbing, done once)
# --------------------------------------------------------------------------
def _packed_band_weights(w_oihw, bn_scale, width):
    """OIHW 3x3 weights (+ folded BN scale) -> per-shift banded matrices.

    Returns B of shape (3, 2*width*Cin, 2*width*Cout), bf16, such that for the
    packed layout (two image rows per sublane row)

        out[p] = sum_{d in -1,0,1}  in[p + d] @ B[d + 1]

    equals conv3x3(stride=1, pad=1) along H and W, with BN scale applied.
    Row index of B[d] = i*(W*Cin) + x_in*Cin + ci; col = j*(W*Cout) + x_out*Cout + co.
    """
    Co, Ci, KH, KW = w_oihw.shape
    assert KH == 3 and KW == 3
    wk = jnp.transpose(w_oihw, (2, 3, 1, 0)).astype(jnp.float32)     # (ky,kx,Ci,Co)
    wk = wk * bn_scale[None, None, None, :]                          # fold BN scale

    # kx over (x_in, x_out); ky over (d, i, j): y_in - y_out = 2d + i - j.
    kx = jnp.arange(width)[:, None] - jnp.arange(width)[None, :] + 1          # (W, W)
    kx_valid = (kx >= 0) & (kx <= 2)
    d = jnp.arange(3) - 1
    ky = (2 * d[:, None, None] + jnp.arange(2)[None, :, None]
          - jnp.arange(2)[None, None, :] + 1)                                 # (3, 2, 2)
    ky_valid = (ky >= 0) & (ky <= 2)

    band = wk[jnp.clip(ky, 0, 2)][:, :, :, jnp.clip(kx, 0, 2)]        # (3,2,2,W,W,Ci,Co)
    valid = ky_valid[:, :, :, None, None] & kx_valid[None, None, None, :, :]
    band = jnp.where(valid[..., None, None], band, 0.0)
    band = jnp.transpose(band, (0, 1, 3, 5, 2, 4, 6))                 # (d,i,x_in,Ci,j,x_out,Co)
    return band.reshape(3, 2 * width * Ci, 2 * width * Co).astype(jnp.bfloat16)


def _fold_bn(bn, width, eps):
    scale = (bn["gamma"] / jnp.sqrt(bn["var"] + eps)).astype(jnp.float32)
    bias = (bn["beta"] - bn["mean"] * scale).astype(jnp.float32)
    return scale, jnp.tile(bias, 2 * width)[None, :]                  # (1, 2*W*C) f32


def basic_block_forward(x_nchw, w1, w2, bn1, bn2, eps=1e-5, num_blocks=None):
    """x_nchw: (N, Cin, H, W) f32 (PyTorch layout).
       w1: (Cmid, Cin, 3, 3), w2: (Cout, Cmid, 3, 3) OIHW, bias=False.
       bn*: dicts gamma/beta/mean/var (eval-mode BN, running stats)."""
    N, Cin, H, W = x_nchw.shape
    Cmid, Cout = w1.shape[0], w2.shape[0]
    assert Cout == Cin, "downsample=None requires planes == inplanes"
    assert H % 2 == 0, "packed layout folds 2 image rows per sublane row"
    Hp = H // 2

    if num_blocks is None:
        # Single-TC chips (v5e/v6e): 1 block (a multi-step grid is pure
        # per-step overhead here).  v7x (2 TensorCores): 2 parallel blocks.
        try:
            kind = jax.devices()[0].device_kind.lower()
        except Exception:
            kind = ""
        two_tc = ("v7" in kind) or ("7x" in kind)
        num_blocks = 2 if (two_tc and N >= 2 and N % 2 == 0) else 1
    assert N % num_blocks == 0
    rows_per_block = (N // num_blocks) * Hp

    # NCHW -> packed lane-dense rows (N*Hp, 2*W*Cin): row = n*Hp + p,
    # lane = (y & 1)*W*Cin + x*Cin + ci.
    # TODO(synk): accept/return this layout end-to-end to drop these
    # wrapper-side HBM round trips at real shapes.
    x_rows = jnp.transpose(x_nchw, (0, 2, 3, 1)).reshape(N * Hp, 2 * W * Cin)

    s1, b1 = _fold_bn(bn1, W, eps)
    s2, b2 = _fold_bn(bn2, W, eps)
    wb1 = _packed_band_weights(w1, s1, W)        # (3, 2*W*Cin,  2*W*Cmid) bf16
    wb2 = _packed_band_weights(w2, s2, W)        # (3, 2*W*Cmid, 2*W*Cout) bf16

    kernel = functools.partial(_basic_block_kernel, Hp=Hp)

    out_rows = pl.pallas_call(
        kernel,
        out_shape=jax.ShapeDtypeStruct((N * Hp, 2 * W * Cout), jnp.float32),
        grid=(num_blocks,),
        in_specs=[
            pl.BlockSpec((rows_per_block, 2 * W * Cin), lambda g: (g, 0)),
            # grid-invariant operands (constant index_map -> block reused, no re-DMA)
            pl.BlockSpec((3, 2 * W * Cin, 2 * W * Cmid), lambda g: (0, 0, 0)),
            pl.BlockSpec((1, 2 * W * Cmid), lambda g: (0, 0)),
            pl.BlockSpec((3, 2 * W * Cmid, 2 * W * Cout), lambda g: (0, 0, 0)),
            pl.BlockSpec((1, 2 * W * Cout), lambda g: (0, 0)),
        ],
        out_specs=pl.BlockSpec((rows_per_block, 2 * W * Cout), lambda g: (g, 0)),
        compiler_params=pltpu.CompilerParams(
            dimension_semantics=("parallel",)),
    )(x_rows, wb1, b1, wb2, b2)

    # (N*Hp, 2*W*Cout) -> NCHW
    out_nhwc = out_rows.reshape(N, Hp, 2, W, Cout).reshape(N, H, W, Cout)
    return jnp.transpose(out_nhwc, (0, 3, 1, 2))


# --------------------------------------------------------------------------
# Pure-JAX reference (mirrors the PyTorch module, eval-mode BN, f32)
# --------------------------------------------------------------------------
def _reference_forward(x, w1, w2, bn1, bn2, eps=1e-5):
    x = jnp.maximum(x, 0.0)
    residual = x

    def conv(inp, w):
        return jax.lax.conv_general_dilated(
            inp, w, window_strides=(1, 1), padding=((1, 1), (1, 1)),
            dimension_numbers=("NCHW", "OIHW", "NCHW"),
            precision=jax.lax.Precision.HIGHEST)

    def bn(inp, p):
        s = (p["gamma"] / jnp.sqrt(p["var"] + eps))[None, :, None, None]
        b = (p["beta"] - p["mean"] * p["gamma"] / jnp.sqrt(p["var"] + eps))[None, :, None, None]
        return inp * s + b

    out = jnp.maximum(bn(conv(x, w1), bn1), 0.0)
    out = bn(conv(out, w2), bn2)
    return out + residual


if __name__ == "__main__":
    # BasicBlock(inplanes=4, planes=4, cfg=8, stride=1, downsample=None)
    N, Cin, H, W = 2, 4, 16, 16
    Cmid, Cout = 8, Cin

    key = jax.random.PRNGKey(0)
    kx, kw1, kw2, kg1, kb1, kg2, kb2 = jax.random.split(key, 7)

    x = jax.random.normal(kx, (N, Cin, H, W), jnp.float32)
    w1 = jax.random.normal(kw1, (Cmid, Cin, 3, 3), jnp.float32) * 0.2
    w2 = jax.random.normal(kw2, (Cout, Cmid, 3, 3), jnp.float32) * 0.2

    bn1 = dict(
        gamma=jax.random.uniform(kg1, (Cmid,), minval=0.5, maxval=1.5),
        beta=jax.random.normal(kb1, (Cmid,)) * 0.1,
        mean=0.05 * jnp.arange(Cmid, dtype=jnp.float32),
        var=1.0 + 0.1 * jnp.arange(Cmid, dtype=jnp.float32),
    )
    bn2 = dict(
        gamma=jax.random.uniform(kg2, (Cout,), minval=0.5, maxval=1.5),
        beta=jax.random.normal(kb2, (Cout,)) * 0.1,
        mean=0.03 * jnp.arange(Cout, dtype=jnp.float32),
        var=1.0 + 0.2 * jnp.arange(Cout, dtype=jnp.float32),
    )

    out = jax.block_until_ready(basic_block_forward(x, w1, w2, bn1, bn2))
    ref = jax.block_until_ready(_reference_forward(x, w1, w2, bn1, bn2))

    assert out.shape == (N, Cin, H, W)
    # bf16 MXU operands -> relaxed tolerance (f32 accumulation, f32 VPU epilogue).
    max_err = float(jnp.max(jnp.abs(out - ref)))
    assert jnp.allclose(out, ref, atol=1.5e-1, rtol=2e-2), \
        f"max abs err = {max_err}"

    print("KERNEL_OK")
</pallas_src>

<mosaic_0001>
module attributes {stable_mosaic.version = 11 : i64} {
  func.func @_basic_block_kernel(%arg0: i32, %arg1: memref<16x128xf32, #tpu.memory_space<vmem>>, %arg2: memref<3x128x256xbf16, #tpu.memory_space<vmem>>, %arg3: memref<1x256xf32, #tpu.memory_space<vmem>>, %arg4: memref<3x256x128xbf16, #tpu.memory_space<vmem>>, %arg5: memref<1x128xf32, #tpu.memory_space<vmem>>, %arg6: memref<16x128xf32, #tpu.memory_space<vmem>>) attributes {dimension_semantics = [#tpu.dimension_semantics<parallel>], iteration_bounds = array<i64: 1>, scalar_prefetch = 0 : i64, scratch_operands = 0 : i64, tpu.core_type = #tpu.core_type<tc>, window_params = [{transform_indices = @transform_0, window_bounds = array<i64: 16, 128>}, {pipeline_mode = #tpu.pipeline_mode<synchronous>, transform_indices = @transform_1, window_bounds = array<i64: 3, 128, 256>}, {pipeline_mode = #tpu.pipeline_mode<synchronous>, transform_indices = @transform_2, window_bounds = array<i64: 1, 256>}, {pipeline_mode = #tpu.pipeline_mode<synchronous>, transform_indices = @transform_3, window_bounds = array<i64: 3, 256, 128>}, {pipeline_mode = #tpu.pipeline_mode<synchronous>, transform_indices = @transform_4, window_bounds = array<i64: 1, 128>}, {transform_indices = @transform_5, window_bounds = array<i64: 16, 128>}]} {
    %c0 = arith.constant 0 : index
    %c0_0 = arith.constant 0 : index
    %0 = vector.load %arg1[%c0, %c0_0] : memref<16x128xf32, #tpu.memory_space<vmem>>, vector<16x128xf32>
    %cst = arith.constant 0.000000e+00 : f32
    %1 = vector.broadcast %cst : f32 to vector<16x128xf32>
    %2 = arith.maximumf %0, %1 : vector<16x128xf32>
    %3 = tpu.iota {dimensions = array<i32: 0>} : vector<16x1xi32>
    %c8_i32 = arith.constant 8 : i32
    %c0_i32 = arith.constant 0 : i32
    %4 = arith.cmpi eq, %c8_i32, %c0_i32 : i32
    %c1_i32 = arith.constant 1 : i32
    %5 = arith.select %4, %c1_i32, %c8_i32 : i32
    %6 = vector.broadcast %5 : i32 to vector<16x1xi32>
    %7 = arith.remsi %3, %6 : vector<16x1xi32>
    %c0_i32_1 = arith.constant 0 : i32
    %8 = vector.broadcast %c0_i32_1 : i32 to vector<16x1xi32>
    %9 = arith.cmpi ne, %7, %8 : vector<16x1xi32>
    %c0_i32_2 = arith.constant 0 : i32
    %10 = vector.broadcast %c0_i32_2 : i32 to vector<16x1xi32>
    %11 = arith.cmpi slt, %7, %10 : vector<16x1xi32>
    %c0_i32_3 = arith.constant 0 : i32
    %12 = arith.cmpi slt, %5, %c0_i32_3 : i32
    %13 = vector.broadcast %12 : i1 to vector<16x1xi1>
    %14 = vector.broadcast %13 : vector<16x1xi1> to vector<16x1xi1>
    %15 = arith.xori %11, %14 : vector<16x1xi1>
    %16 = arith.andi %15, %9 : vector<16x1xi1>
    %17 = vector.broadcast %5 : i32 to vector<16x1xi32>
    %18 = arith.addi %7, %17 : vector<16x1xi32>
    %19 = arith.select %16, %18, %7 : vector<16x1xi1>, vector<16x1xi32>
    %20 = arith.truncf %2 : vector<16x128xf32> to vector<16x128xbf16>
    %c1 = arith.constant 1 : index
    %c0_4 = arith.constant 0 : index
    %c0_5 = arith.constant 0 : index
    %21 = vector.load %arg2[%c1, %c0_4, %c0_5] : memref<3x128x256xbf16, #tpu.memory_space<vmem>>, vector<1x128x256xbf16>
    %22 = vector.shape_cast %21 : vector<1x128x256xbf16> to vector<128x256xbf16>
    %cst_6 = arith.constant dense<0.000000e+00> : vector<16x256xf32>
    %23 = tpu.matmul %20, %22, %cst_6 {dimension_numbers = #tpu.dot_dimension_numbers<[1], [0], [0], [1], [0, 0, 1, 1], [], []>} : vector<16x128xbf16>, vector<128x256xbf16>, vector<16x256xf32> -> vector<16x256xf32>
    %c1_i32_7 = arith.constant 1 : i32
    %24 = tpu.dynamic_rotate %2 by %c1_i32_7 dim 0 : vector<16x128xf32>, i32 -> vector<16x128xf32>
    %c-1_i32 = arith.constant -1 : i32
    %25 = vector.broadcast %c-1_i32 : i32 to vector<16x1xi32>
    %26 = arith.addi %19, %25 : vector<16x1xi32>
    %c0_i32_8 = arith.constant 0 : i32
    %27 = vector.broadcast %c0_i32_8 : i32 to vector<16x1xi32>
    %28 = arith.cmpi sge, %26, %27 : vector<16x1xi32>
    %c-1_i32_9 = arith.constant -1 : i32
    %29 = vector.broadcast %c-1_i32_9 : i32 to vector<16x1xi32>
    %30 = arith.addi %19, %29 : vector<16x1xi32>
    %c8_i32_10 = arith.constant 8 : i32
    %31 = vector.broadcast %c8_i32_10 : i32 to vector<16x1xi32>
    %32 = arith.cmpi slt, %30, %31 : vector<16x1xi32>
    %33 = arith.andi %28, %32 : vector<16x1xi1>
    %cst_11 = arith.constant 0.000000e+00 : f32
    %34 = vector.shape_cast %33 : vector<16x1xi1> to vector<16x1xi1>
    %35 = vector.broadcast %34 : vector<16x1xi1> to vector<16x128xi1>
    %36 = vector.broadcast %cst_11 : f32 to vector<16x128xf32>
    %37 = arith.select %35, %24, %36 : vector<16x128xi1>, vector<16x128xf32>
    %38 = arith.truncf %37 : vector<16x128xf32> to vector<16x128xbf16>
    %c0_12 = arith.constant 0 : index
    %c0_13 = arith.constant 0 : index
    %c0_14 = arith.constant 0 : index
    %39 = vector.load %arg2[%c0_12, %c0_13, %c0_14] : memref<3x128x256xbf16, #tpu.memory_space<vmem>>, vector<1x128x256xbf16>
    %40 = vector.shape_cast %39 : vector<1x128x256xbf16> to vector<128x256xbf16>
    %cst_15 = arith.constant dense<0.000000e+00> : vector<16x256xf32>
    %41 = tpu.matmul %38, %40, %cst_15 {dimension_numbers = #tpu.dot_dimension_numbers<[1], [0], [0], [1], [0, 0, 1, 1], [], []>} : vector<16x128xbf16>, vector<128x256xbf16>, vector<16x256xf32> -> vector<16x256xf32>
    %42 = arith.addf %23, %41 : vector<16x256xf32>
    %c15_i32 = arith.constant 15 : i32
    %43 = tpu.dynamic_rotate %2 by %c15_i32 dim 0 : vector<16x128xf32>, i32 -> vector<16x128xf32>
    %c1_i32_16 = arith.constant 1 : i32
    %44 = vector.broadcast %c1_i32_16 : i32 to vector<16x1xi32>
    %45 = arith.addi %19, %44 : vector<16x1xi32>
    %c0_i32_17 = arith.constant 0 : i32
    %46 = vector.broadcast %c0_i32_17 : i32 to vector<16x1xi32>
    %47 = arith.cmpi sge, %45, %46 : vector<16x1xi32>
    %c1_i32_18 = arith.constant 1 : i32
    %48 = vector.broadcast %c1_i32_18 : i32 to vector<16x1xi32>
    %49 = arith.addi %19, %48 : vector<16x1xi32>
    %c8_i32_19 = arith.constant 8 : i32
    %50 = vector.broadcast %c8_i32_19 : i32 to vector<16x1xi32>
    %51 = arith.cmpi slt, %49, %50 : vector<16x1xi32>
    %52 = arith.andi %47, %51 : vector<16x1xi1>
    %cst_20 = arith.constant 0.000000e+00 : f32
    %53 = vector.shape_cast %52 : vector<16x1xi1> to vector<16x1xi1>
    %54 = vector.broadcast %53 : vector<16x1xi1> to vector<16x128xi1>
    %55 = vector.broadcast %cst_20 : f32 to vector<16x128xf32>
    %56 = arith.select %54, %43, %55 : vector<16x128xi1>, vector<16x128xf32>
    %57 = arith.truncf %56 : vector<16x128xf32> to vector<16x128xbf16>
    %c2 = arith.constant 2 : index
    %c0_21 = arith.constant 0 : index
    %c0_22 = arith.constant 0 : index
    %58 = vector.load %arg2[%c2, %c0_21, %c0_22] : memref<3x128x256xbf16, #tpu.memory_space<vmem>>, vector<1x128x256xbf16>
    %59 = vector.shape_cast %58 : vector<1x128x256xbf16> to vector<128x256xbf16>
    %cst_23 = arith.constant dense<0.000000e+00> : vector<16x256xf32>
    %60 = tpu.matmul %57, %59, %cst_23 {dimension_numbers = #tpu.dot_dimension_numbers<[1], [0], [0], [1], [0, 0, 1, 1], [], []>} : vector<16x128xbf16>, vector<128x256xbf16>, vector<16x256xf32> -> vector<16x256xf32>
    %61 = arith.addf %42, %60 : vector<16x256xf32>
    %c0_24 = arith.constant 0 : index
    %c0_25 = arith.constant 0 : index
    %62 = vector.load %arg3[%c0_24, %c0_25] : memref<1x256xf32, #tpu.memory_space<vmem>>, vector<1x256xf32>
    %63 = vector.broadcast %62 : vector<1x256xf32> to vector<16x256xf32>
    %64 = arith.addf %61, %63 : vector<16x256xf32>
    %cst_26 = arith.constant 0.000000e+00 : f32
    %65 = vector.broadcast %cst_26 : f32 to vector<16x256xf32>
    %66 = arith.maximumf %64, %65 : vector<16x256xf32>
    %67 = arith.truncf %66 : vector<16x256xf32> to vector<16x256xbf16>
    %c1_27 = arith.constant 1 : index
    %c0_28 = arith.constant 0 : index
    %c0_29 = arith.constant 0 : index
    %68 = vector.load %arg4[%c1_27, %c0_28, %c0_29] : memref<3x256x128xbf16, #tpu.memory_space<vmem>>, vector<1x256x128xbf16>
    %69 = vector.shape_cast %68 : vector<1x256x128xbf16> to vector<256x128xbf16>
    %cst_30 = arith.constant dense<0.000000e+00> : vector<16x128xf32>
    %70 = tpu.matmul %67, %69, %cst_30 {dimension_numbers = #tpu.dot_dimension_numbers<[1], [0], [0], [1], [0, 0, 1, 1], [], []>} : vector<16x256xbf16>, vector<256x128xbf16>, vector<16x128xf32> -> vector<16x128xf32>
    %c1_i32_31 = arith.constant 1 : i32
    %71 = tpu.dynamic_rotate %66 by %c1_i32_31 dim 0 : vector<16x256xf32>, i32 -> vector<16x256xf32>
    %c-1_i32_32 = arith.constant -1 : i32
    %72 = vector.broadcast %c-1_i32_32 : i32 to vector<16x1xi32>
    %73 = arith.addi %19, %72 : vector<16x1xi32>
    %c0_i32_33 = arith.constant 0 : i32
    %74 = vector.broadcast %c0_i32_33 : i32 to vector<16x1xi32>
    %75 = arith.cmpi sge, %73, %74 : vector<16x1xi32>
    %c-1_i32_34 = arith.constant -1 : i32
    %76 = vector.broadcast %c-1_i32_34 : i32 to vector<16x1xi32>
    %77 = arith.addi %19, %76 : vector<16x1xi32>
    %c8_i32_35 = arith.constant 8 : i32
    %78 = vector.broadcast %c8_i32_35 : i32 to vector<16x1xi32>
    %79 = arith.cmpi slt, %77, %78 : vector<16x1xi32>
    %80 = arith.andi %75, %79 : vector<16x1xi1>
    %cst_36 = arith.constant 0.000000e+00 : f32
    %81 = vector.shape_cast %80 : vector<16x1xi1> to vector<16x1xi1>
    %82 = vector.broadcast %81 : vector<16x1xi1> to vector<16x256xi1>
    %83 = vector.broadcast %cst_36 : f32 to vector<16x256xf32>
    %84 = arith.select %82, %71, %83 : vector<16x256xi1>, vector<16x256xf32>
    %85 = arith.truncf %84 : vector<16x256xf32> to vector<16x256xbf16>
    %c0_37 = arith.constant 0 : index
    %c0_38 = arith.constant 0 : index
    %c0_39 = arith.constant 0 : index
    %86 = vector.load %arg4[%c0_37, %c0_38, %c0_39] : memref<3x256x128xbf16, #tpu.memory_space<vmem>>, vector<1x256x128xbf16>
    %87 = vector.shape_cast %86 : vector<1x256x128xbf16> to vector<256x128xbf16>
    %cst_40 = arith.constant dense<0.000000e+00> : vector<16x128xf32>
    %88 = tpu.matmul %85, %87, %cst_40 {dimension_numbers = #tpu.dot_dimension_numbers<[1], [0], [0], [1], [0, 0, 1, 1], [], []>} : vector<16x256xbf16>, vector<256x128xbf16>, vector<16x128xf32> -> vector<16x128xf32>
    %89 = arith.addf %70, %88 : vector<16x128xf32>
    %c15_i32_41 = arith.constant 15 : i32
    %90 = tpu.dynamic_rotate %66 by %c15_i32_41 dim 0 : vector<16x256xf32>, i32 -> vector<16x256xf32>
    %c1_i32_42 = arith.constant 1 : i32
    %91 = vector.broadcast %c1_i32_42 : i32 to vector<16x1xi32>
    %92 = arith.addi %19, %91 : vector<16x1xi32>
    %c0_i32_43 = arith.constant 0 : i32
    %93 = vector.broadcast %c0_i32_43 : i32 to vector<16x1xi32>
    %94 = arith.cmpi sge, %92, %93 : vector<16x1xi32>
    %c1_i32_44 = arith.constant 1 : i32
    %95 = vector.broadcast %c1_i32_44 : i32 to vector<16x1xi32>
    %96 = arith.addi %19, %95 : vector<16x1xi32>
    %c8_i32_45 = arith.constant 8 : i32
    %97 = vector.broadcast %c8_i32_45 : i32 to vector<16x1xi32>
    %98 = arith.cmpi slt, %96, %97 : vector<16x1xi32>
    %99 = arith.andi %94, %98 : vector<16x1xi1>
    %cst_46 = arith.constant 0.000000e+00 : f32
    %100 = vector.shape_cast %99 : vector<16x1xi1> to vector<16x1xi1>
    %101 = vector.broadcast %100 : vector<16x1xi1> to vector<16x256xi1>
    %102 = vector.broadcast %cst_46 : f32 to vector<16x256xf32>
    %103 = arith.select %101, %90, %102 : vector<16x256xi1>, vector<16x256xf32>
    %104 = arith.truncf %103 : vector<16x256xf32> to vector<16x256xbf16>
    %c2_47 = arith.constant 2 : index
    %c0_48 = arith.constant 0 : index
    %c0_49 = arith.constant 0 : index
    %105 = vector.load %arg4[%c2_47, %c0_48, %c0_49] : memref<3x256x128xbf16, #tpu.memory_space<vmem>>, vector<1x256x128xbf16>
    %106 = vector.shape_cast %105 : vector<1x256x128xbf16> to vector<256x128xbf16>
    %cst_50 = arith.constant dense<0.000000e+00> : vector<16x128xf32>
    %107 = tpu.matmul %104, %106, %cst_50 {dimension_numbers = #tpu.dot_dimension_numbers<[1], [0], [0], [1], [0, 0, 1, 1], [], []>} : vector<16x256xbf16>, vector<256x128xbf16>, vector<16x128xf32> -> vector<16x128xf32>
    %108 = arith.addf %89, %107 : vector<16x128xf32>
    %c0_51 = arith.constant 0 : index
    %c0_52 = arith.constant 0 : index
    %109 = vector.load %arg5[%c0_51, %c0_52] : memref<1x128xf32, #tpu.memory_space<vmem>>, vector<1x128xf32>
    %110 = vector.broadcast %109 : vector<1x128xf32> to vector<16x128xf32>
    %111 = arith.addf %108, %110 : vector<16x128xf32>
    %112 = arith.addf %111, %2 : vector<16x128xf32>
    %c0_53 = arith.constant 0 : index
    %c0_54 = arith.constant 0 : index
    %113 = vector.load %arg6[%c0_53, %c0_54] : memref<16x128xf32, #tpu.memory_space<vmem>>, vector<16x128xf32>
    tpu.vector_store %arg6[%c0_53, %c0_54], %112 {strides = array<i32>} : memref<16x128xf32, #tpu.memory_space<vmem>>, vector<16x128xf32>,
    return
  }
  func.func @transform_0(%arg0: i32) -> (i32, i32) {
    %c0_i32 = arith.constant 0 : i32
    %c0_i32_0 = arith.constant 0 : i32
    return %arg0, %c0_i32 : i32, i32
  }
  func.func @transform_1(%arg0: i32) -> (i32, i32, i32) {
    %c0_i32 = arith.constant 0 : i32
    %c0_i32_0 = arith.constant 0 : i32
    %c0_i32_1 = arith.constant 0 : i32
    %c0_i32_2 = arith.constant 0 : i32
    return %c0_i32, %c0_i32_0, %c0_i32_1 : i32, i32, i32
  }
  func.func @transform_2(%arg0: i32) -> (i32, i32) {
    %c0_i32 = arith.constant 0 : i32
    %c0_i32_0 = arith.constant 0 : i32
    %c0_i32_1 = arith.constant 0 : i32
    return %c0_i32, %c0_i32_0 : i32, i32
  }
  func.func @transform_3(%arg0: i32) -> (i32, i32, i32) {
    %c0_i32 = arith.constant 0 : i32
    %c0_i32_0 = arith.constant 0 : i32
    %c0_i32_1 = arith.constant 0 : i32
    %c0_i32_2 = arith.constant 0 : i32
    return %c0_i32, %c0_i32_0, %c0_i32_1 : i32, i32, i32
  }
  func.func @transform_4(%arg0: i32) -> (i32, i32) {
    %c0_i32 = arith.constant 0 : i32
    %c0_i32_0 = arith.constant 0 : i32
    %c0_i32_1 = arith.constant 0 : i32
    return %c0_i32, %c0_i32_0 : i32, i32
  }
  func.func @transform_5(%arg0: i32) -> (i32, i32) {
    %c0_i32 = arith.constant 0 : i32
    %c0_i32_0 = arith.constant 0 : i32
    return %arg0, %c0_i32 : i32, i32
  }
}

</mosaic_0001>

<bundles_post_ra>
// kernel: tpu_custom_call.1
= control target key start
LH: loop header
LB: loop body
LE: loop exit
PB: predicated region body
PF: predicated region fallthrough
CT: control target
= control target key end

     0   :  { %10 = vsyncpa [#allocation3], 0  ;;  %s1679_s0 = inlined_call_operand.hbm [shape: f32[16,128], index: 0, kind: input, shape index: {}]   ;;  %s1680_s1 = inlined_call_operand.hbm [shape: bf16[3,128,256], index: 1, kind: input, shape index: {}]   ;;  %s1681_s2 = inlined_call_operand.vmem [shape: f32[1,256], index: 2, kind: input, shape index: {}]   ;;  %s1682_s3 = inlined_call_operand.hbm [shape: bf16[3,256,128], index: 3, kind: input, shape index: {}]   ;;  %s1683_s4 = inlined_call_operand.vmem [shape: f32[1,128], index: 4, kind: input, shape index: {}]   ;;  %s1684_s5 = inlined_call_operand.hbm [shape: f32[16,128], index: 5, kind: output, shape index: {}]  }
   0x1   :  { %11 = vsyncpa [#allocation6], 0 }
   0x2   :  { %12 = vsyncpa [#allocation4], 0  ;;  %s1546_s18 = smov [#allocation5]   ;;  %s1547_s20 = smov [#allocation2]  }
   0x3   :  { %s30_s19 = sshll.u32 %s1546_s18, 4  ;;  %s18_s21 = sshll.u32 %s1547_s20, 4  ;;  %s31_s19 = int_to_ptr.vmem [resolvable:$true] %s30_s19  ;;  %s19_s21 = int_to_ptr.vmem [resolvable:$true] %s18_s21 }
   0x4   :  { %s1468_s22 = scalar_lea.vmem %s31_s19, 6144  ;;  %p1473_p1 = scmp.lt.s32.totalorder %s31_s19, %s31_s19 }
   0x5   :  { %p1469_p0 = scmp.ne.s32.totalorder %s31_s19, %s1468_s22  ;;  %p1474_p2 = scmp.lt.s32.totalorder %s1468_s22, %s1468_s22 }
   0x7   :  { %p1475_p3 = por %p1474_p2, %p1473_p1 }
   0x9   :  { %p1476_p4 = pnand %p1475_p3, %p1469_p0 }
   0xb   :  { %1479 = shalt.err (!%p1476_p4)
}
   0xc   :  { %s1548_s23 = smov 128   ;;  %s1549_s24 = smov 8  }
   0xd   :  { %36 = dma.hbm_to_vmem [thread:$0]  %s1680_s1, 6144, %s31_s19, [#allocation6], %s1548_s23, %s1548_s23, %s1549_s24  }
   0xe   :  { %s1488_s27 = scalar_lea.vmem %s19_s21, 256  ;;  %p1493_p6 = scmp.lt.s32.totalorder %s19_s21, %s19_s21 }
   0xf   :  { %p1489_p5 = scmp.ne.s32.totalorder %s19_s21, %s1488_s27  ;;  %p1494_p7 = scmp.lt.s32.totalorder %s1488_s27, %s1488_s27 }
  0x11   :  { %p1495_p8 = por %p1494_p7, %p1493_p6 }
  0x13   :  { %p1496_p9 = pnand %p1495_p8, %p1489_p5 }
  0x15   :  { %1499 = shalt.err (!%p1496_p9)
}
  0x16   :  { %24 = dma.hbm_to_vmem [thread:$0]  %s1679_s0, 256, %s19_s21, [#allocation3], %s1548_s23, %s1548_s23, %s1549_s24  }
  0x17   :  { %s1550_s30 = smov [#allocation7]  }
  0x18   :  { %s44_s6 = sshll.u32 %s1550_s30, 4  ;;  %s45_s6 = int_to_ptr.vmem [resolvable:$true] %s44_s6 }
  0x19   :  { %s1508_s7 = scalar_lea.vmem %s45_s6, 6144  ;;  %p1513_p11 = scmp.lt.s32.totalorder %s45_s6, %s45_s6 }
  0x1a   :  { %p1509_p10 = scmp.ne.s32.totalorder %s45_s6, %s1508_s7  ;;  %p1514_p12 = scmp.lt.s32.totalorder %s1508_s7, %s1508_s7 }
  0x1c   :  { %p1515_p13 = por %p1514_p12, %p1513_p11 }
  0x1e   :  { %p1516_p0 = pnand %p1515_p13, %p1509_p10 }
  0x20   :  { %1519 = shalt.err (!%p1516_p0)
}
  0x21   :  { %s1551_s1 = smov 64   ;;  %s1552_s8 = smov 4  }
  0x22   :  { %50 = dma.hbm_to_vmem [thread:$0]  %s1682_s3, 6144, %s45_s6, [#allocation6], %s1551_s1, %s1551_s1, %s1552_s8  }
  0x23   :  { %1540 = dma.done.wait [#allocation3], 256  }
  0x24   :  { %1541 = vsyncadd [#allocation3], 4294967040 }
  0x25   :  { %1542 = dma.done.wait [#allocation6], 12288  }
  0x26   :  { %1543 = vsyncadd [#allocation6], 4294955008  ;;  %v1553_v0 = vmov 0   ;;  %v1340_v1 = vld [vmem:[#allocation5 + $0x74] ss:$8 sps:$4 sm:$0xff]   ;;  %v67_v13 = vlaneseq  ;;  %s1554_s12 = smov [#allocation8]  }
  0x27   :  { %260 = vmatprep.mubr.bf16.mxu0 %v1553_v0  ;;  %383 = vmatprep.mubr.bf16.mxu1 %v1553_v0  ;;  %v1342_v2 = vld [vmem:[#allocation5 + $0xf4] ss:$8 sps:$4 sm:$0xff]   ;;  %v1344_v3 = vld [vmem:[#allocation5 + $0x70] ss:$8 sps:$4 sm:$0xff]   ;;  %v1346_v5 = vld [vmem:[#allocation5 + $0x64] ss:$8 sps:$4 sm:$0xff]  }
  0x28   :  { %228 = vmatprep.subr.bf16.mxu0 %v1340_v1  ;;  %v1345_v4 = vld [vmem:[#allocation5 + $0xf0] ss:$8 sps:$4 sm:$0xff]   ;;  %351 = vmatprep.subr.bf16.mxu1 %v1342_v2  ;;  %v1348_v6 = vld [vmem:[#allocation5 + $0xe4] ss:$8 sps:$4 sm:$0xff]   ;;  %v1350_v7 = vld [vmem:[#allocation5 + $0x60] ss:$8 sps:$4 sm:$0xff]  }
  0x29   :  { %229 = vmatpush1.bf16.msra.mxu0 %v1344_v3  ;;  %352 = vmatpush1.bf16.msra.mxu1 %v1345_v4  ;;  %v1351_v8 = vld [vmem:[#allocation5 + $0xe0] ss:$8 sps:$4 sm:$0xff]   ;;  %v1352_v9 = vld [vmem:[#allocation5 + $0x54] ss:$8 sps:$4 sm:$0xff]   ;;  %v1356_v11 = vld [vmem:[#allocation5 + $0x50] ss:$8 sps:$4 sm:$0xff]  }
  0x2a   :  { %230 = vmatprep.subr.bf16.mxu0 %v1346_v5  ;;  %353 = vmatprep.subr.bf16.mxu1 %v1348_v6  ;;  %v1354_v10 = vld [vmem:[#allocation5 + $0xd4] ss:$8 sps:$4 sm:$0xff]   ;;  %v1357_v12 = vld [vmem:[#allocation5 + $0xd0] ss:$8 sps:$4 sm:$0xff]   ;;  %v1358_v14 = vld [vmem:[#allocation5 + $0x44] ss:$8 sps:$4 sm:$0xff]  }
  0x2b   :  { %v1360_v15 = vld [vmem:[#allocation5 + $0xc4] ss:$8 sps:$4 sm:$0xff]   ;;  %v1362_v16 = vld [vmem:[#allocation5 + $0x40] ss:$8 sps:$4 sm:$0xff]   ;;  %v1602_v17 = vshrl.u32 %v67_v13, 7  ;;  %v63_v32 = vld [vmem:[#allocation2] sm:$0xff] }
  0x2c   :  { %v1363_v18 = vld [vmem:[#allocation5 + $0xc0] ss:$8 sps:$4 sm:$0xff]   ;;  %v1364_v19 = vld [vmem:[#allocation5 + $0x34] ss:$8 sps:$4 sm:$0xff]   ;;  %v1368_v21 = vld [vmem:[#allocation5 + $0x30] ss:$8 sps:$4 sm:$0xff]  }
  0x2d   :  { %231 = vmatpush1.bf16.msra.mxu0 %v1350_v7  ;;  %354 = vmatpush1.bf16.msra.mxu1 %v1351_v8  ;;  %v1366_v20 = vld [vmem:[#allocation5 + $0xb4] ss:$8 sps:$4 sm:$0xff]   ;;  %v1369_v22 = vld [vmem:[#allocation5 + $0xb0] ss:$8 sps:$4 sm:$0xff]   ;;  %v69_v23 = vadd.s32 8, %v1602_v17  ;;  %v74_v27 = vand.u32 7, %v1602_v17 }
  0x2e   :  { %232 = vmatprep.subr.bf16.mxu0 %v1352_v9  ;;  %355 = vmatprep.subr.bf16.mxu1 %v1354_v10  ;;  %v1370_v24 = vld [vmem:[#allocation5 + $0x24] ss:$8 sps:$4 sm:$0xff]   ;;  %v1374_v26 = vld [vmem:[#allocation5 + $0x20] ss:$8 sps:$4 sm:$0xff]   ;;  %v1376_v30 = vld [vmem:[#allocation5 + $0x14] ss:$8 sps:$4 sm:$0xff]  }
  0x2f   :  { %v1372_v25 = vld [vmem:[#allocation5 + $0xa4] ss:$8 sps:$4 sm:$0xff]   ;;  %v81_v28 = vand.u32 7, %v69_v23  ;;  %v1375_v29 = vld [vmem:[#allocation5 + $0xa0] ss:$8 sps:$4 sm:$0xff]   ;;  %v64_v33 = vld [vmem:[#allocation2 + $0x8] sm:$0xff] }
  0x30   :  { %v1378_v31 = vld [vmem:[#allocation5 + $0x94] ss:$8 sps:$4 sm:$0xff]   ;;  %v1606_v34 = vmax.f32 %v63_v32, 0.0  ;;  %v1608_v35 = vmax.f32 %v64_v33, 0.0  ;;  %v1380_v36 = vld [vmem:[#allocation5 + $0x10] ss:$8 sps:$4 sm:$0xff]  }
  0x31   :  { %233 = vmatpush1.bf16.msra.mxu0 %v1356_v11  ;;  %356 = vmatpush1.bf16.msra.mxu1 %v1357_v12  ;;  %v117_v37 = vadd.s32 4294967295, %v74_v27  ;;  %v118_v38 = vadd.s32 4294967295, %v81_v28  ;;  %v1381_v39 = vld [vmem:[#allocation5 + $0x90] ss:$8 sps:$4 sm:$0xff]   ;;  %v1382_v42 = vld [vmem:[#allocation5 + $0x4] ss:$8 sps:$4 sm:$0xff]  }
  0x32   :  { %234 = vmatprep.subr.bf16.mxu0 %v1358_v14  ;;  %357 = vmatprep.subr.bf16.mxu1 %v1360_v15  ;;  %v112_v40 = vrot.slane %v1606_v34, 7  ;;  %v113_v41 = vrot.slane %v1608_v35, 7  ;;  %v1384_v43 = vld [vmem:[#allocation5 + $0x84] ss:$8 sps:$4 sm:$0xff]   ;;  %vm114_vm0 = vcmp.lt.s32.totalorder %v1602_v17, 1  ;;  %v94_v51 = vpack.c.bf16 %v1608_v35, %v1606_v34  ;;  %v1412_v11 = vld [vmem:[#allocation7 + $0xf8] sm:$0xff]  }
  0x33   :  { %vm119_vm1 = vcmp.ge.s32.totalorder %v117_v37, 0  ;;  %v1386_v44 = vld [vmem:[#allocation5] ss:$8 sps:$4 sm:$0xff]   ;;  %vm120_vm2 = vcmp.ge.s32.totalorder %v118_v38, 0  ;;  %v1390_v48 = vld [vmem:[#allocation5 + $0x174] ss:$8 sps:$4 sm:$0xff]  }
  0x34   :  { %v1387_v45 = vld [vmem:[#allocation5 + $0x80] ss:$8 sps:$4 sm:$0xff]   ;;  %v115_v46 = vsel %vm114_vm0, %v112_v40, %v113_v41  ;;  %v116_v47 = vsel %vm114_vm0, %v113_v41, %v112_v40  ;;  %vm1617_vm3 = vmpackc.low %vm120_vm2, %vm119_vm1  ;;  %v399_v52 = vadd.s32 1, %v74_v27  ;;  %v1388_v53 = vld [vmem:[#allocation5 + $0x170] ss:$8 sps:$4 sm:$0xff]   ;;  %v400_v55 = vadd.s32 1, %v81_v28 }
  0x35   :  { %235 = vmatpush1.bf16.msra.mxu0 %v1362_v16  ;;  %358 = vmatpush1.bf16.msra.mxu1 %v1363_v18  ;;  %v1167_v50 = vpack.c.bf16 %v115_v46, %v116_v47  ;;  %v1393_v54 = vld [vmem:[#allocation5 + $0x164] ss:$8 sps:$4 sm:$0xff]   ;;  %v394_v56 = vrot.slane %v1606_v34, 1  ;;  %v395_v57 = vrot.slane %v1608_v35, 1  ;;  %v1391_v58 = vld [vmem:[#allocation5 + $0x160] ss:$8 sps:$4 sm:$0xff]  }
  0x36   :  { %236 = vmatprep.subr.bf16.mxu0 %v1364_v19  ;;  %359 = vmatprep.subr.bf16.mxu1 %v1366_v20  ;;  %v1396_v59 = vld [vmem:[#allocation5 + $0x154] ss:$8 sps:$4 sm:$0xff]   ;;  %v1394_v60 = vld [vmem:[#allocation5 + $0x150] ss:$8 sps:$4 sm:$0xff]   ;;  %v1399_v61 = vld [vmem:[#allocation5 + $0x144] ss:$8 sps:$4 sm:$0xff]  }
  0x37   :  { %v1397_v62 = vld [vmem:[#allocation5 + $0x140] ss:$8 sps:$4 sm:$0xff]   ;;  %v1402_v63 = vld [vmem:[#allocation5 + $0x134] ss:$8 sps:$4 sm:$0xff]   ;;  %vm403_vm4 = vcmp.lt.s32.totalorder %v399_v52, 8  ;;  %vm404_vm5 = vcmp.lt.s32.totalorder %v400_v55, 8 }
  0x38   :  { %v1400_v1 = vld [vmem:[#allocation5 + $0x130] ss:$8 sps:$4 sm:$0xff]   ;;  %v1405_v2 = vld [vmem:[#allocation5 + $0x124] ss:$8 sps:$4 sm:$0xff]   ;;  %vm396_vm6 = vcmp.lt.s32.totalorder %v1602_v17, 7  ;;  %vm1629_vm7 = vmpackc.low %vm404_vm5, %vm403_vm4  ;;  %s1137_s13 = sshll.u32 %s1554_s12, 4  ;;  %s1138_s13 = int_to_ptr.vmem [resolvable:$true] %s1137_s13 }
  0x39   :  { %237 = vmatpush1.bf16.msra.mxu0 %v1368_v21  ;;  %360 = vmatpush1.bf16.msra.mxu1 %v1369_v22  ;;  %v1403_v3 = vld [vmem:[#allocation5 + $0x120] ss:$8 sps:$4 sm:$0xff]   ;;  %v1408_v4 = vld [vmem:[#allocation5 + $0x114] ss:$8 sps:$4 sm:$0xff]   ;;  %v1411_v5 = vld [vmem:[#allocation5 + $0x104] ss:$8 sps:$4 sm:$0xff]   ;;  %v397_v8 = vsel %vm396_vm6, %v394_v56, %v395_v57  ;;  %v398_v9 = vsel %vm396_vm6, %v395_v57, %v394_v56  ;;  %p1525_p2 = scmp.lt.s32.totalorder %s1138_s13, %s1138_s13 }
  0x3a   :  { %238 = vmatprep.subr.bf16.mxu0 %v1370_v24  ;;  %361 = vmatprep.subr.bf16.mxu1 %v1372_v25  ;;  %v1409_v7 = vld [vmem:[#allocation5 + $0x100] ss:$8 sps:$4 sm:$0xff]   ;;  %v1202_v10 = vpack.c.bf16 %v398_v9, %v397_v8  ;;  %v1413_v12 = vld [vmem:[#allocation7 + $0xb8] sm:$0xff]   ;;  %v1416_v15 = vld [vmem:[#allocation7 + $0xf0] sm:$0xff]   ;;  %s1520_s14 = scalar_lea.vmem %s1138_s13, 256 }
  0x3b   :  { %v1414_v13 = vld [vmem:[#allocation7 + $0x78] sm:$0xff]   ;;  %v1418_v16 = vld [vmem:[#allocation7 + $0x70] sm:$0xff]   ;;  %v1420_v20 = vld [vmem:[#allocation7 + $0xe8] sm:$0xff]   ;;  %p1521_p1 = scmp.ne.s32.totalorder %s1138_s13, %s1520_s14  ;;  %p1526_p3 = scmp.lt.s32.totalorder %s1520_s14, %s1520_s14 }
  0x3c   :  { %v1415_v14 = vld [vmem:[#allocation7 + $0x38] sm:$0xff]   ;;  %v1417_v18 = vld [vmem:[#allocation7 + $0xb0] sm:$0xff]   ;;  %v1422_v21 = vld [vmem:[#allocation7 + $0x68] sm:$0xff]  }
  0x3d   :  { %239 = vmatpush1.bf16.msra.mxu0 %v1374_v26  ;;  %362 = vmatpush1.bf16.msra.mxu1 %v1375_v29  ;;  %v1419_v19 = vld [vmem:[#allocation7 + $0x30] sm:$0xff]   ;;  %v1421_v22 = vld [vmem:[#allocation7 + $0xa8] sm:$0xff]   ;;  %v1424_v24 = vld [vmem:[#allocation7 + $0xe0] sm:$0xff]   ;;  %p1527_p4 = por %p1526_p3, %p1525_p2 }
  0x3e   :  { %240 = vmatprep.subr.bf16.mxu0 %v1376_v30  ;;  %363 = vmatprep.subr.bf16.mxu1 %v1378_v31  ;;  %v1423_v23 = vld [vmem:[#allocation7 + $0x28] sm:$0xff]   ;;  %v1426_v25 = vld [vmem:[#allocation7 + $0x60] sm:$0xff]   ;;  %v1428_v28 = vld [vmem:[#allocation7 + $0xd8] sm:$0xff]  }
  0x3f   :  { %v1425_v26 = vld [vmem:[#allocation7 + $0xa0] sm:$0xff]   ;;  %v1429_v29 = vld [vmem:[#allocation7 + $0x98] sm:$0xff]   ;;  %v1432_v32 = vld [vmem:[#allocation7 + $0xd0] sm:$0xff]   ;;  %p1528_p5 = pnand %p1527_p4, %p1521_p1 }
  0x40   :  { %v1427_v27 = vld [vmem:[#allocation7 + $0x20] sm:$0xff]   ;;  %v1430_v30 = vld [vmem:[#allocation7 + $0x58] sm:$0xff]   ;;  %v1433_v33 = vld [vmem:[#allocation7 + $0x90] sm:$0xff]  }
  0x41   :  { %241 = vmatpush1.bf16.msra.mxu0 %v1380_v36  ;;  %364 = vmatpush1.bf16.msra.mxu1 %v1381_v39  ;;  %v1431_v31 = vld [vmem:[#allocation7 + $0x18] sm:$0xff]   ;;  %v1434_v36 = vld [vmem:[#allocation7 + $0x50] sm:$0xff]   ;;  %v1436_v38 = vld [vmem:[#allocation7 + $0xc8] sm:$0xff]  }
  0x42   :  { %242 = vmatprep.subr.bf16.mxu0 %v1382_v42  ;;  %365 = vmatprep.subr.bf16.mxu1 %v1384_v43  ;;  %v1435_v37 = vld [vmem:[#allocation7 + $0x10] sm:$0xff]   ;;  %v1437_v39 = vld [vmem:[#allocation7 + $0x88] sm:$0xff]   ;;  %v1440_v42 = vld [vmem:[#allocation7 + $0xc0] sm:$0xff]  }
  0x43   :  { %v1438_v40 = vld [vmem:[#allocation7 + $0x48] sm:$0xff]   ;;  %v1441_v43 = vld [vmem:[#allocation7 + $0x80] sm:$0xff]   ;;  %v1444_v46 = vld [vmem:[#allocation7 + $0x178] sm:$0xff]  }
  0x44   :  { %v1439_v41 = vld [vmem:[#allocation7 + $0x8] sm:$0xff]   ;;  %v558_v56 = vld [vmem:[%s1681_s2] sm:$0x3] }
  0x45   :  { %243 = vmatpush1.bf16.msra.mxu0 %v1386_v44  ;;  %366 = vmatpush1.bf16.msra.mxu1 %v1387_v45  ;;  %v1442_v44 = vld [vmem:[#allocation7 + $0x40] sm:$0xff]   ;;  %v1454_v49 = vld [vmem:[#allocation7 + $0x150] sm:$0xff]  }
  0x46   :  { %511 = vmatprep.subr.bf16.mxu0 %v1390_v48  ;;  %1265 = vmatprep.subr.bf16.mxu1 %v1414_v13  ;;  %v1443_v45 = vld [vmem:[#allocation7] sm:$0xff]   ;;  %v1264_v6 = vld [vmem:[%s1683_s4] ss:$0 sm:$0xff] }
  0x48   :  { %1168 = vmatmul.mubr.msk.bf16.vlgmr.msra.gmra.mxu0 %vm1617_vm3, %v1167_v50  ;;  %384 = vmatmul.mubr.bf16.vlgmr.msra.gmra.mxu1 %v94_v51 }
  0x49   :  { %512 = vmatpush1.bf16.msra.mxu0 %v1388_v53  ;;  %543 = vmatprep.mubr.bf16.mxu0 %v1553_v0  ;;  %v1406_v0 = vld [vmem:[#allocation5 + $0x110] ss:$8 sps:$4 sm:$0xff]   ;;  %v562_v53 = vsub.s32 0, %v1602_v17 }
  0x4a   :  { %513 = vmatprep.subr.bf16.mxu0 %v1393_v54  ;;  %1266 = vmatpush3.bf16.msra.mxu1 %v1415_v14  ;;  %v566_v54 = vsub.s32 1, %v1602_v17 }
  0x4b   :  { %1267 = vmatprep.subr.bf16.mxu1 %v1418_v16 }
  0x4d   :  { %514 = vmatpush1.bf16.msra.mxu0 %v1391_v58 }
  0x4e   :  { %515 = vmatprep.subr.bf16.mxu0 %v1396_v59  ;;  %1268 = vmatpush3.bf16.msra.mxu1 %v1419_v19 }
  0x4f   :  { %1269 = vmatprep.subr.bf16.mxu1 %v1422_v21 }
  0x51   :  { %516 = vmatpush1.bf16.msra.mxu0 %v1394_v60 }
  0x52   :  { %517 = vmatprep.subr.bf16.mxu0 %v1399_v61  ;;  %1270 = vmatpush3.bf16.msra.mxu1 %v1423_v23 }
  0x53   :  { %1271 = vmatprep.subr.bf16.mxu1 %v1426_v25 }
  0x55   :  { %518 = vmatpush1.bf16.msra.mxu0 %v1397_v62  ;;  %v563_v62 = vrot.slane %v558_v56, %v562_v53 }
  0x56   :  { %519 = vmatprep.subr.bf16.mxu0 %v1402_v63  ;;  %1272 = vmatpush3.bf16.msra.mxu1 %v1427_v27  ;;  %v567_v63 = vrot.slane %v558_v56, %v566_v54  ;;  %v1459_v54 = vld [vmem:[#allocation7 + $0x100] sm:$0xff]  }
  0x57   :  { %1273 = vmatprep.subr.bf16.mxu1 %v1430_v30 }
  0x59   :  { %520 = vmatpush1.bf16.msra.mxu0 %v1400_v1 }
  0x5a   :  { %521 = vmatprep.subr.bf16.mxu0 %v1405_v2  ;;  %1274 = vmatpush3.bf16.msra.mxu1 %v1431_v31 }
  0x5b   :  { %1275 = vmatprep.subr.bf16.mxu1 %v1434_v36  ;;  %v1445_v36 = vld [vmem:[#allocation7 + $0x138] sm:$0xff]  }
  0x5d   :  { %522 = vmatpush1.bf16.msra.mxu0 %v1403_v3 }
  0x5e   :  { %523 = vmatprep.subr.bf16.mxu0 %v1408_v4  ;;  %1276 = vmatpush3.bf16.msra.mxu1 %v1435_v37 }
  0x5f   :  { %1277 = vmatprep.subr.bf16.mxu1 %v1438_v40  ;;  %v1447_v40 = vld [vmem:[#allocation7 + $0x130] sm:$0xff]  }
  0x61   :  { %524 = vmatpush1.bf16.msra.mxu0 %v1406_v0 }
  0x62   :  { %525 = vmatprep.subr.bf16.mxu0 %v1411_v5  ;;  %1278 = vmatpush3.bf16.msra.mxu1 %v1439_v41  ;;  %v1448_v41 = vld [vmem:[#allocation7 + $0x168] sm:$0xff]  }
  0x63   :  { %1279 = vmatprep.subr.bf16.mxu1 %v1442_v44  ;;  %v1451_v44 = vld [vmem:[#allocation7 + $0x120] sm:$0xff]  }
  0x65   :  { %526 = vmatpush1.bf16.msra.mxu0 %v1409_v7 }
  0x66   :  { %1287 = vmatprep.subr.bf16.mxu0 %v1412_v11  ;;  %1280 = vmatpush3.bf16.msra.mxu1 %v1443_v45  ;;  %v1452_v45 = vld [vmem:[#allocation7 + $0x158] sm:$0xff]  }
  0x67   :  { %1309 = vmatprep.subr.bf16.mxu1 %v1444_v46  ;;  %v1453_v46 = vld [vmem:[#allocation7 + $0x118] sm:$0xff]  }
  0x68   :  { %1203 = vmatmul.mubr.msk.bf16.vlgmr.msra.gmra.mxu0 %vm1629_vm7, %v1202_v10 }
  0x69   :  { %1288 = vmatpush3.bf16.msra.mxu0 %v1413_v12 }
  0x6a   :  { %1289 = vmatprep.subr.bf16.mxu0 %v1416_v15 }
  0x6d   :  { %1290 = vmatpush3.bf16.msra.mxu0 %v1417_v18 }
  0x6e   :  { %1291 = vmatprep.subr.bf16.mxu0 %v1420_v20 }
  0x71   :  { %1292 = vmatpush3.bf16.msra.mxu0 %v1421_v22 }
  0x72   :  { %1293 = vmatprep.subr.bf16.mxu0 %v1424_v24 }
  0x75   :  { %1294 = vmatpush3.bf16.msra.mxu0 %v1425_v26 }
  0x76   :  { %1295 = vmatprep.subr.bf16.mxu0 %v1428_v28 }
  0x79   :  { %1296 = vmatpush3.bf16.msra.mxu0 %v1429_v29 }
  0x7a   :  { %1297 = vmatprep.subr.bf16.mxu0 %v1432_v32 }
  0x7d   :  { %1298 = vmatpush3.bf16.msra.mxu0 %v1433_v33 }
  0x7e   :  { %1299 = vmatprep.subr.bf16.mxu0 %v1436_v38  ;;  %v1446_v38 = vld [vmem:[#allocation7 + $0x170] sm:$0xff]  }
  0x81   :  { %1300 = vmatpush3.bf16.msra.mxu0 %v1437_v39 }
  0x82   :  { %1301 = vmatprep.subr.bf16.mxu0 %v1440_v42  ;;  %v1449_v42 = vld [vmem:[#allocation7 + $0x128] sm:$0xff]  }
  0x85   :  { %1302 = vmatpush3.bf16.msra.mxu0 %v1441_v43  ;;  %v1450_v43 = vld [vmem:[#allocation7 + $0x160] sm:$0xff]  }
 0x108   :  { %v262_v47 = vpop.f32.mrf.mxu0  ;;  %v385_v50 = vpop.f32.mrf.mxu1 }
 0x109   :  { %v386_v57 = vadd.f32 %v385_v50, %v262_v47  ;;  %v1455_v47 = vld [vmem:[#allocation7 + $0x110] sm:$0xff]   ;;  %v1457_v50 = vld [vmem:[#allocation7 + $0x108] sm:$0xff]  }
 0x10a   :  { %v264_v48 = vpop.f32.mrf.mxu0  ;;  %v387_v52 = vpop.f32.mrf.mxu1 }
 0x10b   :  { %v388_v60 = vadd.f32 %v387_v52, %v264_v48  ;;  %v1456_v48 = vld [vmem:[#allocation7 + $0x148] sm:$0xff]  }
 0x10c   :  { %v266_v51 = vpop.f32.mrf.mxu0  ;;  %v389_v58 = vpop.f32.mrf.mxu1 }
 0x10d   :  { %v390_v2 = vadd.f32 %v389_v58, %v266_v51  ;;  %v1458_v51 = vld [vmem:[#allocation7 + $0x140] sm:$0xff]  }
 0x10e   :  { %v268_v55 = vpop.f32.mrf.mxu0  ;;  %v391_v3 = vpop.f32.mrf.mxu1 }
 0x10f   :  { %v392_v9 = vadd.f32 %v391_v3, %v268_v55 }
 0x128   :  { %v545_v59 = vpop.f32.mrf.mxu0 }
 0x129   :  { %v554_v61 = vadd.f32 %v545_v59, %v386_v57 }
 0x12a   :  { %v547_v1 = vpop.f32.mrf.mxu0 }
 0x12b   :  { %v555_v4 = vadd.f32 %v547_v1, %v388_v60  ;;  %v570_v5 = vadd.f32 %v563_v62, %v554_v61 }
 0x12c   :  { %v549_v0 = vpop.f32.mrf.mxu0 }
 0x12d   :  { %v571_v7 = vadd.f32 %v567_v63, %v555_v4  ;;  %v556_v8 = vadd.f32 %v549_v0, %v390_v2  ;;  %v574_v13 = vmax.f32 %v570_v5, 0.0 }
 0x12e   :  { %v551_v10 = vpop.f32.mrf.mxu0 }
 0x12f   :  { %v572_v11 = vadd.f32 %v563_v62, %v556_v8  ;;  %v557_v12 = vadd.f32 %v551_v10, %v392_v9  ;;  %v575_v14 = vmax.f32 %v571_v7, 0.0  ;;  %v613_v20 = vrot.slane %v574_v13, 7 }
 0x130   :  { %v933_v53 = vrot.slane %v574_v13, 1 }
 0x131   :  { %v576_v15 = vmax.f32 %v572_v11, 0.0  ;;  %v573_v16 = vadd.f32 %v567_v63, %v557_v12  ;;  %v614_v21 = vrot.slane %v575_v14, 7  ;;  %v934_v22 = vrot.slane %v575_v14, 1 }
 0x133   :  { %v615_v18 = vrot.slane %v576_v15, 7  ;;  %v577_v19 = vmax.f32 %v573_v16, 0.0  ;;  %v578_v28 = vpack.c.bf16 %v576_v15, %v574_v13  ;;  %v935_v52 = vrot.slane %v576_v15, 1 }
 0x135   :  { %v616_v23 = vrot.slane %v577_v19, 7  ;;  %v936_v24 = vrot.slane %v577_v19, 1  ;;  %v579_v25 = vpack.c.bf16 %v577_v19, %v575_v14  ;;  %v617_v26 = vsel %vm114_vm0, %v613_v20, %v615_v18 }
 0x136   :  { %v619_v27 = vsel %vm114_vm0, %v615_v18, %v613_v20  ;;  %v937_v55 = vsel %vm396_vm6, %v933_v53, %v935_v52  ;;  %v939_v56 = vsel %vm396_vm6, %v935_v52, %v933_v53 }
 0x137   :  { %924 = vmatprep.mubr.bf16.mxu0 %v579_v25  ;;  %v618_v29 = vsel %vm114_vm0, %v614_v21, %v616_v23  ;;  %v620_v30 = vsel %vm114_vm0, %v616_v23, %v614_v21  ;;  %v938_v31 = vsel %vm396_vm6, %v934_v22, %v936_v24  ;;  %v940_v32 = vsel %vm396_vm6, %v936_v24, %v934_v22 }
 0x138   :  { %925 = vmatmul.mubr.bf16.vlgmr.msra.gmra.mxu0 %v578_v28  ;;  %v1221_v33 = vpack.c.bf16 %v618_v29, %v620_v30  ;;  %v1224_v37 = vpack.c.bf16 %v617_v26, %v619_v27  ;;  %v1259_v39 = vpack.c.bf16 %v940_v32, %v938_v31  ;;  %v1262_v57 = vpack.c.bf16 %v939_v56, %v937_v55 }
 0x13a   :  { %1222 = vmatprep.mubr.msk.bf16.mxu1 %vm1617_vm3, %v1221_v33 }
 0x13b   :  { %1225 = vmatmul.mubr.msk.bf16.vlgmr.msra.gmra.mxu1 %vm1617_vm3, %v1224_v37 }
 0x13c   :  { %1310 = vmatpush3.bf16.msra.mxu1 %v1445_v36  ;;  %1260 = vmatprep.mubr.msk.bf16.mxu1 %vm1629_vm7, %v1259_v39 }
 0x13d   :  { %1311 = vmatprep.subr.bf16.mxu1 %v1446_v38 }
 0x140   :  { %1312 = vmatpush3.bf16.msra.mxu1 %v1447_v40 }
 0x141   :  { %1313 = vmatprep.subr.bf16.mxu1 %v1448_v41 }
 0x144   :  { %1314 = vmatpush3.bf16.msra.mxu1 %v1449_v42 }
 0x145   :  { %1315 = vmatprep.subr.bf16.mxu1 %v1450_v43 }
 0x148   :  { %1316 = vmatpush3.bf16.msra.mxu1 %v1451_v44 }
 0x149   :  { %1317 = vmatprep.subr.bf16.mxu1 %v1452_v45 }
 0x14c   :  { %1318 = vmatpush3.bf16.msra.mxu1 %v1453_v46 }
 0x14d   :  { %1319 = vmatprep.subr.bf16.mxu1 %v1454_v49 }
 0x150   :  { %1320 = vmatpush3.bf16.msra.mxu1 %v1455_v47 }
 0x151   :  { %1321 = vmatprep.subr.bf16.mxu1 %v1456_v48 }
 0x154   :  { %1322 = vmatpush3.bf16.msra.mxu1 %v1457_v50 }
 0x155   :  { %1323 = vmatprep.subr.bf16.mxu1 %v1458_v51 }
 0x158   :  { %1324 = vmatpush3.bf16.msra.mxu1 %v1459_v54 }
 0x15b   :  { %1263 = vmatmul.mubr.msk.bf16.vlgmr.msra.gmra.mxu1 %vm1629_vm7, %v1262_v57 }
 0x1f8   :  { %v1303_v59 = vpop.f32.mrf.mxu0 }
 0x1fa   :  { %v1304_v61 = vpop.f32.mrf.mxu0 }
 0x1fb   :  { %v1281_v58 = vpop.f32.mrf.mxu1  ;;  %v1305_v4 = vadd.f32 %v1304_v61, %v1303_v59 }
 0x1fc   :  { %v1306_v63 = vpop.f32.mrf.mxu0 }
 0x1fd   :  { %v1282_v60 = vpop.f32.mrf.mxu1 }
 0x1fe   :  { %v1283_v2 = vadd.f32 %v1282_v60, %v1281_v58  ;;  %v1307_v0 = vpop.f32.mrf.mxu0 }
 0x1ff   :  { %v1284_v62 = vpop.f32.mrf.mxu1  ;;  %v1308_v10 = vadd.f32 %v1307_v0, %v1306_v63 }
 0x200   :  { %v927_v7 = vadd.f32 %v1305_v4, %v1283_v2 }
 0x201   :  { %v1285_v1 = vpop.f32.mrf.mxu1 }
 0x202   :  { %v1286_v17 = vadd.f32 %v1285_v1, %v1284_v62 }
 0x204   :  { %v930_v13 = vadd.f32 %v1308_v10, %v1286_v17 }
 0x21b   :  { %v1325_v3 = vpop.f32.mrf.mxu1 }
 0x21d   :  { %v1326_v5 = vpop.f32.mrf.mxu1 }
 0x21e   :  { %v1327_v8 = vadd.f32 %v1326_v5, %v1325_v3 }
 0x21f   :  { %v1328_v9 = vpop.f32.mrf.mxu1 }
 0x220   :  { %v1117_v11 = vadd.f32 %v1327_v8, %v927_v7 }
 0x221   :  { %v1329_v12 = vpop.f32.mrf.mxu1 }
 0x222   :  { %v1126_v14 = vadd.f32 %v1264_v6, %v1117_v11  ;;  %v1330_v15 = vadd.f32 %v1329_v12, %v1328_v9 }
 0x224   :  { %v1118_v16 = vadd.f32 %v1330_v15, %v930_v13  ;;  %v1128_v18 = vadd.f32 %v1126_v14, %v1606_v34 }
 0x226   :  { %v1127_v19 = vadd.f32 %v1264_v6, %v1118_v16  ;;  %1130 = vst [vmem:[#allocation8] sm:$0xff] %v1128_v18 }
 0x228   :  { %v1129_v20 = vadd.f32 %v1127_v19, %v1608_v35 }
 0x22a   :  { %1131 = vst [vmem:[#allocation8 + $0x8] sm:$0xff] %v1129_v20 }
 0x22b   :  { %1531 = shalt.err (!%p1528_p5)
}
 0x22c   :  { %1143 = dma.vmem_to_hbm [thread:$0]  %s1138_s13, 256, %s1684_s5, [#allocation4], %s1548_s23, %s1548_s23, %s1549_s24  }
 0x22d   :  { %1544 = dma.done.wait [#allocation4], 256  }
 0x22e   :  { %1545 = vsyncadd [#allocation4], 4294967040 }
 0x22f   :  { %1147 = vsyncpa [#allocation3], 1 }
 0x230   :  { %1148 = vsyncpa [#allocation6], 1 }
 0x231   :  { %1149 = vsyncpa [#allocation4], 1 }

</bundles_post_ra>
